<compile_context>
chip_gen: v6e
topology: v6e:2x2x1
jax: 0.10.0
libtpu: 0.0.40
codegen_flags: <defaults>
</compile_context>

<pallas_src>
import jax
import jax.numpy as jnp
import numpy as np
from jax.experimental import pallas as pl
from jax.experimental.pallas import tpu as pltpu

# Module hyper-parameters (from __init__ defaults).
GAMMA_NEG = 4.0
GAMMA_POS = 1.0
CLIP = 0.05
EPS = 1e-8

# Padding logit for a ragged label axis: sigmoid(-30) ~ 0, so with a 0 target
# the padded element's loss is exactly (1-y)*log(min(1+clip,1)) * 0^4 = 0.
_PAD_LOGIT = -30.0


def _round_up(n, m):
    return ((n + m - 1) // m) * m


def _tpu_generation():
    """Best-effort (VMEM capacity bytes, TensorCores visible per program)."""
    vmem_cap = 128 * 1024 * 1024
    n_tc = 1
    try:
        kind = jax.devices()[0].device_kind.lower()
        if "7" in kind:                        # v7x: 64 MiB VMEM, 2 TC / chip
            vmem_cap, n_tc = 64 * 1024 * 1024, 2
        elif "v4" in kind or "v5p" in kind:    # megacore: 2 TC per device
            n_tc = 2
    except Exception:
        pass
    try:
        vmem_cap = pltpu.get_tpu_info().vmem_capacity_bytes
    except Exception:
        pass
    return vmem_cap, n_tc


def _make_kernel(*, tile_rows, blocks_per_core, b, c_pad, need_row_mask):
    folds = tile_rows // 8

    def tile_contribution(x_raw, y_raw, row_mask):
        x = x_raw.astype(jnp.float32)
        is_pos = y_raw != 0                       # hard 0/1 labels
        # sigmoid via tanh identity: 1 EUP push instead of exp + recip.
        xs_pos = 0.5 * jnp.tanh(0.5 * x) + 0.5
        xs_neg = jnp.minimum((1.0 - xs_pos) + CLIP, 1.0)   # asymmetric clip
        # Hard labels collapse both CE terms into one log of the selected p.
        pt = jnp.where(is_pos, xs_pos, xs_neg)
        log_pt = jnp.log(jnp.maximum(pt, EPS))
        # (1-pt)^gamma with gamma_pos=1 / gamma_neg=4 -> select + squaring.
        t = 1.0 - pt
        t2 = t * t
        w = jnp.where(is_pos, t, t2 * t2)
        loss = log_pt * w
        if row_mask is not None:
            loss = jnp.where(row_mask, loss, 0.0)
        # Fold rows down to an (8, c_pad) slab with pure VPU adds: the reshape
        # regroups whole (8,128) sublane tiles (no data movement, no XLU).
        return jnp.sum(loss.reshape(folds, 8, c_pad), axis=0)

    def kernel(x_ref, y_ref, o_ref, acc_ref):
        p = pl.program_id(0)            # core-split index ("parallel")
        j = pl.program_id(1)            # row-block step within this core
        n_j = pl.num_programs(1)

        @pl.when(j == 0)
        def _init():
            acc_ref[...] = jnp.zeros_like(acc_ref)

        if need_row_mask:
            row0 = (p * blocks_per_core + j) * tile_rows
            is_full = row0 + tile_rows <= b

            @pl.when(is_full)
            def _full_tile():
                acc_ref[...] += tile_contribution(x_ref[...], y_ref[...], None)

            @pl.when(jnp.logical_not(is_full))
            def _edge_tile():
                rows = row0 + jax.lax.broadcasted_iota(
                    jnp.int32, (tile_rows, c_pad), 0)
                acc_ref[...] += tile_contribution(
                    x_ref[...], y_ref[...], rows < b)
        else:
            acc_ref[...] += tile_contribution(x_ref[...], y_ref[...], None)

        @pl.when(j == n_j - 1)
        def _finalize():
            # Single expensive cross-lane/sublane reduce per core.
            o_ref[0, 0] = jnp.sum(acc_ref[...])

    return kernel


def asymmetric_loss(x, y, *, target_block_bytes=4 << 20, max_tile_rows=2048,
                    num_core_splits=None):
    """Scalar -mean(asymmetric focal loss), matching the PyTorch module for
    hard (0/1) multi-label targets (any nonzero target is treated as 1).
    Accepts f32/bf16 logits and float/int8/bool targets (narrow dtypes cut
    HBM traffic ~2.7x and are the preferred fast path, esp. on v5e)."""
    b, c = x.shape
    vmem_cap, n_tc = _tpu_generation()

    # Lane-dense label axis.  Only the label axis is ever padded (with a large
    # negative logit + 0 target so padded elements contribute exactly 0 and
    # need no in-kernel column mask).  The batch axis is never padded in HBM.
    c_pad = _round_up(max(c, 128), 128)
    if c_pad != c:
        x = jnp.pad(x, ((0, 0), (0, c_pad - c)), constant_values=_PAD_LOGIT)
        y = jnp.pad(y, ((0, 0), (0, c_pad - c)))

    # Dtype-aware minimum row multiple: (32,128) int8/bool, (16,128) bf16/f16,
    # (8,128) f32 -- avoids relayout on the narrow-dtype fast path.
    row_mult = 8
    for dt in (x.dtype, y.dtype):
        isz = jnp.dtype(dt).itemsize
        if isz == 2:
            row_mult = max(row_mult, 16)
        elif isz == 1:
            row_mult = max(row_mult, 32)

    # Largest row tile keeping an f32-equivalent input block near the target
    # size; the accumulator no longer scales with tile_rows, so only the
    # double-buffered inputs bound VMEM.
    tr = target_block_bytes // (c_pad * 4)
    tr = max(row_mult, min(max_tile_rows, tr))
    if b <= tr:
        tile_rows = _round_up(b, row_mult)
    else:
        tile_rows = (tr // row_mult) * row_mult

    n_blocks = pl.cdiv(b, tile_rows)
    if num_core_splits is None:
        num_core_splits = n_tc          # 2 only where two TCs exist (v7x/megacore)
    n_splits = max(1, min(int(num_core_splits), n_blocks))
    blocks_per_core = pl.cdiv(n_blocks, n_splits)

    # Row masking only needed for ragged B or a phantom tile from an uneven
    # core split; it is gated to those (<= 1 per core) tiles via pl.when.
    need_row_mask = n_splits * blocks_per_core * tile_rows != b

    kernel = _make_kernel(tile_rows=tile_rows, blocks_per_core=blocks_per_core,
                          b=b, c_pad=c_pad, need_row_mask=need_row_mask)

    last_block = n_blocks - 1

    def in_map(p, j):
        # Clamp so phantom tiles (uneven core split) re-read an in-bounds
        # block; the kernel fully masks their contribution to 0.
        return (jnp.minimum(p * blocks_per_core + j, last_block), 0)

    in_block = pl.BlockSpec((tile_rows, c_pad), in_map)
    # TODO(synk): if profiling shows exposed DMA on v5e f32 inputs, add
    # pipeline_mode=pl.Buffered(3) to the two in_specs.

    # Generation-aware VMEM budget: double-buffered x & y blocks + tiny acc.
    x_blk = tile_rows * c_pad * jnp.dtype(x.dtype).itemsize
    y_blk = tile_rows * c_pad * jnp.dtype(y.dtype).itemsize
    budget = 2 * (x_blk + y_blk) + 8 * c_pad * 4 + (4 << 20)
    gen_cap = (40 << 20) if vmem_cap <= (64 << 20) else (64 << 20)
    vmem_limit = int(min(max(budget, 16 << 20), gen_cap))

    partials = pl.pallas_call(
        kernel,
        out_shape=jax.ShapeDtypeStruct((n_splits, 1), jnp.float32),
        grid_spec=pltpu.PrefetchScalarGridSpec(
            num_scalar_prefetch=0,
            grid=(n_splits, blocks_per_core),
            in_specs=[in_block, in_block],
            out_specs=pl.BlockSpec((1, 1), lambda p, j: (p, 0),
                                   memory_space=pltpu.SMEM),
            scratch_shapes=[pltpu.VMEM((8, c_pad), jnp.float32)],
        ),
        compiler_params=pltpu.CompilerParams(
            # Leading axis "parallel" -> batch split across both TensorCores
            # where two exist; single-TC chips use n_splits=1 by default.
            dimension_semantics=("parallel", "arbitrary"),
            vmem_limit_bytes=vmem_limit,
        ),
    )(x, y)

    # Each core produced a partial sum; combine + normalize in the wrapper.
    return -jnp.sum(partials) / (b * c)


def _reference(x, y):
    # Pure-JAX reference mirroring the PyTorch forward exactly.
    x = x.astype(jnp.float32)
    y = y.astype(jnp.float32)
    xs_pos = jax.nn.sigmoid(x)
    xs_neg = jnp.minimum(1.0 - xs_pos + CLIP, 1.0)
    los_pos = y * jnp.log(jnp.maximum(xs_pos, EPS))
    los_neg = (1.0 - y) * jnp.log(jnp.maximum(xs_neg, EPS))
    loss = los_pos + los_neg
    pt = xs_pos * y + xs_neg * (1.0 - y)
    gamma = GAMMA_POS * y + GAMMA_NEG * (1.0 - y)
    loss = loss * jnp.power(1.0 - pt, gamma)
    return -jnp.mean(loss)


if __name__ == "__main__":
    key = jax.random.PRNGKey(0)
    k1, k2, k3, k4, k5, k6 = jax.random.split(key, 6)

    # 1) Small aligned f32 problem: 16 samples x 128 labels.
    B, C = 16, 128
    x = jax.random.normal(k1, (B, C), dtype=jnp.float32) * 3.0
    y = (jax.random.uniform(k2, (B, C)) < 0.2).astype(jnp.float32)
    out = jax.block_until_ready(asymmetric_loss(x, y))
    ref = jax.block_until_ready(_reference(x, y))
    np.testing.assert_allclose(np.asarray(out), np.asarray(ref),
                               rtol=2e-5, atol=1e-5)

    # 2) Ragged shapes -> label-axis pad (-30 logits) + ragged-row masking.
    B2, C2 = 13, 100
    x2 = jax.random.normal(k3, (B2, C2), dtype=jnp.float32) * 2.0
    y2 = (jax.random.uniform(k4, (B2, C2)) < 0.3).astype(jnp.float32)
    out2 = jax.block_until_ready(asymmetric_loss(x2, y2))
    ref2 = jax.block_until_ready(_reference(x2, y2))
    np.testing.assert_allclose(np.asarray(out2), np.asarray(ref2),
                               rtol=2e-5, atol=1e-5)

    # 3) Narrow dtypes (bf16 logits, int8 targets): 32-row minimum tile path.
    out3 = jax.block_until_ready(
        asymmetric_loss(x.astype(jnp.bfloat16), y.astype(jnp.int8)))
    ref3 = jax.block_until_ready(
        _reference(x.astype(jnp.bfloat16).astype(jnp.float32), y))
    np.testing.assert_allclose(np.asarray(out3), np.asarray(ref3),
                               rtol=2e-5, atol=1e-5)

    # 4) Multi-step grid + forced 2-way core split with an uneven block count
    #    (exercises the clamped phantom-tile + ragged-edge paths).
    B4, C4 = 600, 128
    x4 = jax.random.normal(k5, (B4, C4), dtype=jnp.float32) * 3.0
    y4 = (jax.random.uniform(k6, (B4, C4)) < 0.1).astype(jnp.float32)
    out4 = jax.block_until_ready(
        asymmetric_loss(x4, y4, target_block_bytes=64 * 1024,
                        max_tile_rows=128, num_core_splits=2))
    ref4 = jax.block_until_ready(_reference(x4, y4))
    np.testing.assert_allclose(np.asarray(out4), np.asarray(ref4),
                               rtol=2e-5, atol=1e-5)

    print("KERNEL_OK")
</pallas_src>

<mosaic_0001>
module attributes {stable_mosaic.version = 11 : i64} {
  func.func @kernel(%arg0: i32, %arg1: i32, %arg2: memref<16x128xf32, #tpu.memory_space<vmem>>, %arg3: memref<16x128xf32, #tpu.memory_space<vmem>>, %arg4: memref<1x1xf32, #tpu.memory_space<smem>>, %arg5: memref<8x128xf32, #tpu.memory_space<vmem>>) attributes {dimension_semantics = [#tpu.dimension_semantics<parallel>, #tpu.dimension_semantics<arbitrary>], iteration_bounds = array<i64: 1, 1>, scalar_prefetch = 0 : i64, scratch_operands = 1 : i64, tpu.core_type = #tpu.core_type<tc>, window_params = [{transform_indices = @transform_0, window_bounds = array<i64: 16, 128>}, {transform_indices = @transform_1, window_bounds = array<i64: 16, 128>}, {transform_indices = @transform_2, window_bounds = array<i64: 1, 1>}]} {
    %c0_i32 = arith.constant 0 : i32
    %0 = arith.cmpi eq, %arg1, %c0_i32 : i32
    %1 = arith.extui %0 : i1 to i32
    %c0_i32_0 = arith.constant 0 : i32
    %2 = arith.cmpi ne, %1, %c0_i32_0 : i32
    scf.if %2 {
      %cst_19 = arith.constant 0.000000e+00 : f32
      %38 = vector.broadcast %cst_19 : f32 to vector<8x128xf32>
      %c0_20 = arith.constant 0 : index
      %c0_21 = arith.constant 0 : index
      %39 = vector.load %arg5[%c0_20, %c0_21] : memref<8x128xf32, #tpu.memory_space<vmem>>, vector<8x128xf32>
      tpu.vector_store %arg5[%c0_20, %c0_21], %38 {strides = array<i32>} : memref<8x128xf32, #tpu.memory_space<vmem>>, vector<8x128xf32>,
    } else {
    }
    %c0 = arith.constant 0 : index
    %c0_1 = arith.constant 0 : index
    %3 = vector.load %arg5[%c0, %c0_1] : memref<8x128xf32, #tpu.memory_space<vmem>>, vector<8x128xf32>
    %c0_2 = arith.constant 0 : index
    %c0_3 = arith.constant 0 : index
    %4 = vector.load %arg2[%c0_2, %c0_3] : memref<16x128xf32, #tpu.memory_space<vmem>>, vector<16x128xf32>
    %c0_4 = arith.constant 0 : index
    %c0_5 = arith.constant 0 : index
    %5 = vector.load %arg3[%c0_4, %c0_5] : memref<16x128xf32, #tpu.memory_space<vmem>>, vector<16x128xf32>
    %cst = arith.constant 0.000000e+00 : f32
    %6 = vector.broadcast %cst : f32 to vector<16x128xf32>
    %7 = arith.cmpf one, %5, %6 : vector<16x128xf32>
    %cst_6 = arith.constant 5.000000e-01 : f32
    %8 = vector.broadcast %cst_6 : f32 to vector<16x128xf32>
    %9 = arith.mulf %8, %4 : vector<16x128xf32>
    %10 = math.tanh %9 : vector<16x128xf32>
    %cst_7 = arith.constant 5.000000e-01 : f32
    %11 = vector.broadcast %cst_7 : f32 to vector<16x128xf32>
    %12 = arith.mulf %11, %10 : vector<16x128xf32>
    %cst_8 = arith.constant 5.000000e-01 : f32
    %13 = vector.broadcast %cst_8 : f32 to vector<16x128xf32>
    %14 = arith.addf %12, %13 : vector<16x128xf32>
    %cst_9 = arith.constant 1.000000e+00 : f32
    %15 = vector.broadcast %cst_9 : f32 to vector<16x128xf32>
    %16 = arith.subf %15, %14 : vector<16x128xf32>
    %cst_10 = arith.constant 5.000000e-02 : f32
    %17 = vector.broadcast %cst_10 : f32 to vector<16x128xf32>
    %18 = arith.addf %16, %17 : vector<16x128xf32>
    %cst_11 = arith.constant 1.000000e+00 : f32
    %19 = vector.broadcast %cst_11 : f32 to vector<16x128xf32>
    %20 = arith.minimumf %18, %19 : vector<16x128xf32>
    %21 = arith.select %7, %14, %20 : vector<16x128xi1>, vector<16x128xf32>
    %cst_12 = arith.constant 9.99999993E-9 : f32
    %22 = vector.broadcast %cst_12 : f32 to vector<16x128xf32>
    %23 = arith.maximumf %21, %22 : vector<16x128xf32>
    %24 = math.log %23 : vector<16x128xf32>
    %cst_13 = arith.constant 1.000000e+00 : f32
    %25 = vector.broadcast %cst_13 : f32 to vector<16x128xf32>
    %26 = arith.subf %25, %21 : vector<16x128xf32>
    %27 = arith.mulf %26, %26 : vector<16x128xf32>
    %28 = arith.mulf %27, %27 : vector<16x128xf32>
    %29 = arith.select %7, %26, %28 : vector<16x128xi1>, vector<16x128xf32>
    %30 = arith.mulf %24, %29 : vector<16x128xf32>
    %31 = vector.shape_cast %30 : vector<16x128xf32> to vector<2x8x128xf32>
    %cst_14 = arith.constant dense<0.000000e+00> : vector<8x128xf32>
    %32 = vector.multi_reduction <add>, %31, %cst_14 [0] : vector<2x8x128xf32> to vector<8x128xf32>
    %33 = arith.addf %3, %32 : vector<8x128xf32>
    %c0_15 = arith.constant 0 : index
    %c0_16 = arith.constant 0 : index
    %34 = vector.load %arg5[%c0_15, %c0_16] : memref<8x128xf32, #tpu.memory_space<vmem>>, vector<8x128xf32>
    tpu.vector_store %arg5[%c0_15, %c0_16], %33 {strides = array<i32>} : memref<8x128xf32, #tpu.memory_space<vmem>>, vector<8x128xf32>,
    %c0_i32_17 = arith.constant 0 : i32
    %35 = arith.cmpi eq, %arg1, %c0_i32_17 : i32
    %36 = arith.extui %35 : i1 to i32
    %c0_i32_18 = arith.constant 0 : i32
    %37 = arith.cmpi ne, %36, %c0_i32_18 : i32
    scf.if %37 {
      %c0_19 = arith.constant 0 : index
      %c0_20 = arith.constant 0 : index
      %38 = vector.load %arg5[%c0_19, %c0_20] : memref<8x128xf32, #tpu.memory_space<vmem>>, vector<8x128xf32>
      %39 = vector.shape_cast %38 : vector<8x128xf32> to vector<1x8x128xf32>
      %cst_21 = arith.constant dense<0.000000e+00> : vector<1xf32>
      %40 = vector.multi_reduction <add>, %39, %cst_21 [1, 2] : vector<1x8x128xf32> to vector<1xf32>
      %41 = vector.shape_cast %40 : vector<1xf32> to vector<1x1x1xf32>
      %42 = vector.extract %41[0, 0, 0] : f32 from vector<1x1x1xf32>
      %c0_22 = arith.constant 0 : index
      %c0_23 = arith.constant 0 : index
      %43 = memref.load %arg4[%c0_22, %c0_23] : memref<1x1xf32, #tpu.memory_space<smem>>
      memref.store %42, %arg4[%c0_22, %c0_23] : memref<1x1xf32, #tpu.memory_space<smem>>
    } else {
    }
    return
  }
  func.func @transform_0(%arg0: i32, %arg1: i32) -> (i32, i32) {
    %c1_i32 = arith.constant 1 : i32
    %0 = arith.muli %arg0, %c1_i32 : i32
    %1 = arith.addi %0, %arg1 : i32
    %c0_i32 = arith.constant 0 : i32
    %2 = arith.minsi %1, %c0_i32 : i32
    %c0_i32_0 = arith.constant 0 : i32
    %c0_i32_1 = arith.constant 0 : i32
    return %2, %c0_i32_0 : i32, i32
  }
  func.func @transform_1(%arg0: i32, %arg1: i32) -> (i32, i32) {
    %c1_i32 = arith.constant 1 : i32
    %0 = arith.muli %arg0, %c1_i32 : i32
    %1 = arith.addi %0, %arg1 : i32
    %c0_i32 = arith.constant 0 : i32
    %2 = arith.minsi %1, %c0_i32 : i32
    %c0_i32_0 = arith.constant 0 : i32
    %c0_i32_1 = arith.constant 0 : i32
    return %2, %c0_i32_0 : i32, i32
  }
  func.func @transform_2(%arg0: i32, %arg1: i32) -> (i32, i32) {
    %c0_i32 = arith.constant 0 : i32
    %c0_i32_0 = arith.constant 0 : i32
    return %arg0, %c0_i32 : i32, i32
  }
}

</mosaic_0001>

<bundles_post_ra>
// kernel: tpu_custom_call.1
= control target key start
LH: loop header
LB: loop body
LE: loop exit
PB: predicated region body
PF: predicated region fallthrough
CT: control target
= control target key end

     0   :  { %7 = vsyncpa [#allocation4], 0  ;;  %s243_s0 = inlined_call_operand.hbm [shape: f32[16,128], index: 0, kind: input, shape index: {}]   ;;  %s244_s1 = inlined_call_operand.hbm [shape: f32[16,128], index: 1, kind: input, shape index: {}]   ;;  %s245_s2 = inlined_call_operand.hbm [shape: f32[1,1], index: 2, kind: output, shape index: {}]  }
   0x1   :  { %8 = vsyncpa [#allocation7], 0 }
   0x2   :  { %9 = vsyncpa [#allocation5], 0  ;;  %s210_s9 = smov [#allocation3]  }
   0x3   :  { %s21_s10 = sshll.u32 %s210_s9, 4  ;;  %s22_s10 = int_to_ptr.vmem [resolvable:$true] %s21_s10 }
   0x4   :  { %s164_s11 = scalar_lea.vmem %s22_s10, 256  ;;  %p169_p1 = scmp.lt.s32.totalorder %s22_s10, %s22_s10 }
   0x5   :  { %p165_p0 = scmp.ne.s32.totalorder %s22_s10, %s164_s11  ;;  %p170_p2 = scmp.lt.s32.totalorder %s164_s11, %s164_s11 }
   0x7   :  { %p171_p3 = por %p170_p2, %p169_p1 }
   0x9   :  { %p172_p4 = pnand %p171_p3, %p165_p0 }
   0xb   :  { %175 = shalt.err (!%p172_p4)
}
   0xc   :  { %s211_s12 = smov 128   ;;  %s212_s13 = smov 8  }
   0xd   :  { %27 = dma.hbm_to_vmem [thread:$0]  %s243_s0, 256, %s22_s10, [#allocation4], %s211_s12, %s211_s12, %s212_s13  }
   0xe   :  { %s213_s16 = smov [#allocation6]  }
   0xf   :  { %s39_s17 = sshll.u32 %s213_s16, 4  ;;  %s40_s17 = int_to_ptr.vmem [resolvable:$true] %s39_s17 }
  0x10   :  { %s184_s18 = scalar_lea.vmem %s40_s17, 256  ;;  %p189_p6 = scmp.lt.s32.totalorder %s40_s17, %s40_s17 }
  0x11   :  { %p185_p5 = scmp.ne.s32.totalorder %s40_s17, %s184_s18  ;;  %p190_p7 = scmp.lt.s32.totalorder %s184_s18, %s184_s18 }
  0x13   :  { %p191_p8 = por %p190_p7, %p189_p6 }
  0x15   :  { %p192_p9 = pnand %p191_p8, %p185_p5 }
  0x17   :  { %195 = shalt.err (!%p192_p9)
}
  0x18   :  { %45 = dma.hbm_to_vmem [thread:$0]  %s244_s1, 256, %s40_s17, [#allocation7], %s211_s12, %s211_s12, %s212_s13  }
  0x19   :  { %204 = dma.done.wait [#allocation4], 256  }
  0x1a   :  { %205 = vsyncadd [#allocation4], 4294967040 }
  0x1b   :  { %206 = dma.done.wait [#allocation7], 256  }
  0x1c   :  { %207 = vsyncadd [#allocation7], 4294967040  ;;  %v66_v0 = vld [vmem:[#allocation3] sm:$0xff]  ;;  %v67_v1 = vld [vmem:[#allocation3 + $0x8] sm:$0xff]  ;;  %s214_s1 = smov [#allocation8]  }
  0x1d   :  { %v72_v2 = vmul.f32 0.5, %v66_v0  ;;  %v73_v3 = vmul.f32 0.5, %v67_v1  ;;  %v68_v10 = vld [vmem:[#allocation6] sm:$0xff]  ;;  %v69_v12 = vld [vmem:[#allocation6 + $0x8] sm:$0xff] }
  0x1e   :  { %vm70_vm0 = vcmp.ne.f32.partialorder %v68_v10, 0.0  ;;  %vm71_vm1 = vcmp.ne.f32.partialorder %v69_v12, 0.0 }
  0x1f   :  { %148 = vtanh.f32 %v72_v2 }
  0x20   :  { %150 = vtanh.f32 %v73_v3 }
  0x2c   :  { %v149_v4 = vpop.eup %148 }
  0x2d   :  { %v151_v5 = vpop.eup %150  ;;  %v76_v6 = vmul.f32 0.5, %v149_v4 }
  0x2e   :  { %v77_v7 = vmul.f32 0.5, %v151_v5 }
  0x2f   :  { %v78_v8 = vadd.f32 0.5, %v76_v6 }
  0x30   :  { %v79_v9 = vadd.f32 0.5, %v77_v7 }
  0x31   :  { %v80_v11 = vsub.f32 1.0, %v78_v8 }
  0x32   :  { %v81_v13 = vsub.f32 1.0, %v79_v9 }
  0x33   :  { %v82_v14 = vadd.f32 0.05, %v80_v11 }
  0x34   :  { %v83_v15 = vadd.f32 0.05, %v81_v13 }
  0x35   :  { %v84_v16 = vmin.f32 %v82_v14, 1.0 }
  0x36   :  { %v85_v17 = vmin.f32 %v83_v15, 1.0 }
  0x37   :  { %v86_v18 = vsel %vm70_vm0, %v78_v8, %v84_v16 }
  0x38   :  { %v87_v19 = vsel %vm71_vm1, %v79_v9, %v85_v17  ;;  %v88_v20 = vmax.f32 %v86_v18, 1e-08  ;;  %v94_v22 = vsub.f32 1.0, %v86_v18 }
  0x39   :  { %v89_v21 = vmax.f32 %v87_v19, 1e-08  ;;  %v95_v23 = vsub.f32 1.0, %v87_v19 }
  0x3a   :  { %152 = vlog2.f32 %v88_v20  ;;  %v96_v24 = vmul.f32 %v94_v22, %v94_v22 }
  0x3b   :  { %154 = vlog2.f32 %v89_v21  ;;  %v97_v25 = vmul.f32 %v95_v23, %v95_v23 }
  0x3c   :  { %v98_v26 = vmul.f32 %v96_v24, %v96_v24 }
  0x3d   :  { %v99_v27 = vmul.f32 %v97_v25, %v97_v25 }
  0x3e   :  { %v100_v29 = vsel %vm70_vm0, %v94_v22, %v98_v26 }
  0x3f   :  { %v101_v32 = vsel %vm71_vm1, %v95_v23, %v99_v27 }
  0x47   :  { %v153_v28 = vpop.eup %152 }
  0x48   :  { %v155_v30 = vpop.eup %154  ;;  %v91_v31 = vmul.f32 0.6931472, %v153_v28 }
  0x49   :  { %v93_v33 = vmul.f32 0.6931472, %v155_v30 }
  0x4a   :  { %v102_v34 = vmul.f32 %v100_v29, %v91_v31 }
  0x4b   :  { %v103_v35 = vmul.f32 %v101_v32, %v93_v33 }
  0x4d   :  { %v104_v36 = vadd.f32 %v103_v35, %v102_v34 }
  0x4f   :  { %111 = vadd.xlane.f32.xlu0 %v104_v36 }
  0xd8   :  { %v112_v37 = vpop.xlane.xlu0 %111 }
  0xd9   :  { %v113_v38 = vrot.slane %v112_v37, 4 }
  0xdb   :  { %v114_v39 = vadd.f32 %v113_v38, %v112_v37 }
  0xdd   :  { %v115_v40 = vrot.slane %v114_v39, 2 }
  0xdf   :  { %v116_v41 = vadd.f32 %v115_v40, %v114_v39 }
  0xe1   :  { %v117_v42 = vrot.slane %v116_v41, 1 }
  0xe3   :  { %v118_v43 = vadd.f32 %v117_v42, %v116_v41 }
  0xe5   :  { %141 = vpush %v118_v43 }
 0x116   :  { %s142_s0 = spop %141 }
 0x117   :  { %121 = sst [smem:[#allocation8]] %s142_s0 }
 0x118   :  { %129 = dma.smem_to_hbm %s214_s1, 16, %s245_s2, [#allocation5]  }
 0x119   :  { %208 = dma.done.wait [#allocation5], 16  }
 0x11a   :  { %209 = vsyncadd [#allocation5], 4294967280 }
 0x11b   :  { %133 = sfence }
 0x11c   :  { %134 = vsyncpa [#allocation4], 1 }
 0x11d   :  { %135 = vsyncpa [#allocation7], 1 }
 0x11e   :  { %136 = vsyncpa [#allocation5], 1 }

</bundles_post_ra>
